<compile_context>
chip_gen: v6e
topology: v6e:2x2x1
jax: 0.10.0
libtpu: 0.0.40
codegen_flags: <defaults>
</compile_context>

<pallas_src>
import math
import functools

import numpy as np
import jax
import jax.numpy as jnp
from jax.experimental import pallas as pl
from jax.experimental.pallas import tpu as pltpu

D_MODEL = 32
NHEAD = 4
D_FF = 256
EPS = 1e-6


def encoder_layer_kernel(x_ref,
                         a1_ref, g1_ref,                  # norm_1 (alpha, bias)
                         wqkv_ref, bqkv_ref,              # fused q/k/v projection
                         wo_ref, bo_ref,                  # attention out projection
                         a2_ref, g2_ref,                  # norm_2 (alpha, bias)
                         w1_ref, b1_ref, w2_ref, b2_ref,  # feed-forward
                         mkd_ref, mjj_ref,                # static head-block masks
                         o_ref,
                         *, nhead):
    f32, bf16 = jnp.float32, jnp.bfloat16
    Bt, S, D = x_ref.shape
    N = Bt * S
    dk = D // nhead
    HS = nhead * S
    inv_sqrt_dk = 1.0 / math.sqrt(dk)

    # (Bt, S, D) -> (Bt*S, D): leading-dim merge only (lane dim unchanged) so
    # every projection / FF matmul has a wide M dimension.
    x = x_ref[...].astype(f32).reshape(N, D)

    def norm(t, alpha, beta):
        # torch.Tensor.std uses the unbiased estimator (ddof = 1).  Exact f32
        # math here (approx reciprocals were the previous numerics failure).
        mean = jnp.mean(t, axis=-1, keepdims=True)
        tc = t - mean
        var = jnp.sum(tc * tc, axis=-1, keepdims=True) * (1.0 / (D - 1))
        return alpha * tc / (jnp.sqrt(var) + EPS) + beta

    # ---------------- self-attention sub-layer ----------------
    x2 = norm(x, a1_ref[...], g1_ref[...])

    # TODO(synk): RippleLinear source was not provided; modeled as a standard
    # affine projection y = x @ W + b.
    qkv = jnp.dot(x2.astype(bf16), wqkv_ref[...],
                  preferred_element_type=f32) + bqkv_ref[...]
    q3 = qkv[:, 0 * D:1 * D].reshape(Bt, S, D)
    k3 = qkv[:, 1 * D:2 * D].reshape(Bt, S, D)
    v3 = qkv[:, 2 * D:3 * D].reshape(Bt, S, D)

    # Block-diagonal multi-head attention (no per-head loop):
    #   k_rep[b, h*S + j, d] = k[b, j, d] if head(d) == h else 0
    # so one batched einsum gives every head's scores, and the context einsum
    # emits the heads already concatenated along D.
    m_kd = mkd_ref[...]                                    # (H*S, D)
    k_rep = jnp.concatenate([k3] * nhead, axis=1) * m_kd   # (Bt, H*S, D)
    v_rep = jnp.concatenate([v3] * nhead, axis=1) * m_kd

    # TODO(synk): src_mask / src_key_padding_mask assumed None; all dropout
    # layers treated as identity (deterministic / eval semantics).
    s = jnp.einsum('bqd,bjd->bqj', q3.astype(bf16), k_rep.astype(bf16),
                   preferred_element_type=f32) * inv_sqrt_dk   # (Bt, S, H*S)
    s = s.reshape(N, HS)
    # Row-global max is a valid shift for every per-head block (softmax is
    # shift-invariant within each block).
    s = s - jnp.max(s, axis=-1, keepdims=True)
    e = jnp.exp(s)
    # Per-head denominators broadcast to every slot of the head's block;
    # kept in f32 for softmax accuracy (tiny matmul).
    denom = jnp.dot(e, mjj_ref[...], preferred_element_type=f32)
    p = (e / jnp.maximum(denom, 1e-30)).reshape(Bt, S, HS)

    ctx = jnp.einsum('bqj,bjd->bqd', p.astype(bf16), v_rep.astype(bf16),
                     preferred_element_type=f32)               # (Bt, S, D)
    attn_out = jnp.dot(ctx.reshape(N, D).astype(bf16), wo_ref[...],
                       preferred_element_type=f32) + bo_ref[...]

    x = x + attn_out

    # ---------------- feed-forward sub-layer -------------------
    x2 = norm(x, a2_ref[...], g2_ref[...])
    hdn = jnp.dot(x2.astype(bf16), w1_ref[...],
                  preferred_element_type=f32) + b1_ref[...]
    hdn = jnp.maximum(hdn, 0.0)
    ff = jnp.dot(hdn.astype(bf16), w2_ref[...],
                 preferred_element_type=f32) + b2_ref[...]

    o_ref[...] = (x + ff).reshape(Bt, S, D).astype(o_ref.dtype)


def trigo_encoder_layer(x, params, block_b=None):
    """x: (B, S, D) f32; params: flat list of weight/bias arrays (x @ W + b layout)."""
    B, S, D = x.shape
    (a1, g1, wq, bq, wk, bk, wv, bv, wo, bo, a2, g2, w1, b1, w2, b2) = params
    nhead = NHEAD
    dk = D // nhead
    HS = nhead * S

    bf16 = jnp.bfloat16
    # Fuse q/k/v into one (D, 3D) matmul; pre-cast matmul weights to bf16 once
    # (biases / norm params stay f32: they are applied after f32 accumulation).
    wqkv = jnp.concatenate([wq, wk, wv], axis=1).astype(bf16)
    bqkv = jnp.concatenate([bq, bk, bv], axis=1)

    # Static head-block masks (built host-side; avoids integer div on the VPU).
    head_of_slot = np.arange(HS) // S          # head owning key-slot j = h*S + k
    head_of_dim = np.arange(D) // dk           # head owning feature dim d
    m_kd = jnp.asarray((head_of_slot[:, None] == head_of_dim[None, :])
                       .astype(np.float32))    # (H*S, D)
    m_jj = jnp.asarray((head_of_slot[:, None] == head_of_slot[None, :])
                       .astype(np.float32))    # (H*S, H*S)

    fused = [a1, g1, wqkv, bqkv, wo.astype(bf16), bo, a2, g2,
             w1.astype(bf16), b1, w2.astype(bf16), b2, m_kd, m_jj]

    # Batch tiling: >= 2 grid steps whenever B >= 2 (v7x megacore), capped at
    # 256 so live intermediates stay inside the default scoped VMEM limit on
    # every TPU generation (including 64 MiB v7x).
    if block_b is None:
        block_b = max(1, min(256, B // 2)) if B >= 2 else 1
    grid_b = pl.cdiv(B, block_b)
    b_pad = grid_b * block_b
    if b_pad != B:
        # Zero-pad the batch instead of shrinking the tile to a divisor of B.
        x = jnp.concatenate([x, jnp.zeros((b_pad - B, S, D), x.dtype)], axis=0)

    def full_spec(p):
        n = p.ndim
        return pl.BlockSpec(p.shape, lambda b, _n=n: (0,) * _n)   # VMEM-resident

    in_specs = [pl.BlockSpec((block_b, S, D), lambda b: (b, 0, 0))]
    in_specs += [full_spec(p) for p in fused]
    out_spec = pl.BlockSpec((block_b, S, D), lambda b: (b, 0, 0))

    kern = functools.partial(encoder_layer_kernel, nhead=nhead)
    out = pl.pallas_call(
        kern,
        out_shape=jax.ShapeDtypeStruct((b_pad, S, D), x.dtype),
        grid=(grid_b,),
        in_specs=in_specs,
        out_specs=out_spec,
        compiler_params=pltpu.CompilerParams(
            # batch blocks are independent -> shard across TCs (v7x megacore)
            dimension_semantics=("parallel",)),
    )(x, *fused)
    return out[:B]


def make_params(key, d_model=D_MODEL, d_ff=D_FF):
    ks = jax.random.split(key, 12)
    init = lambda k, shape, s=0.1: (s * jax.random.normal(k, shape)).astype(jnp.float32)
    params = [
        jnp.ones((1, d_model), jnp.float32),        # norm_1 alpha
        jnp.zeros((1, d_model), jnp.float32),       # norm_1 bias
        init(ks[0], (d_model, d_model)),            # Wq
        init(ks[1], (1, d_model)),                  # bq
        init(ks[2], (d_model, d_model)),            # Wk
        init(ks[3], (1, d_model)),                  # bk
        init(ks[4], (d_model, d_model)),            # Wv
        init(ks[5], (1, d_model)),                  # bv
        init(ks[6], (d_model, d_model)),            # Wo
        init(ks[7], (1, d_model)),                  # bo
        jnp.ones((1, d_model), jnp.float32),        # norm_2 alpha
        jnp.zeros((1, d_model), jnp.float32),       # norm_2 bias
        init(ks[8], (d_model, d_ff)),               # ff W1
        init(ks[9], (1, d_ff)),                     # ff b1
        init(ks[10], (d_ff, d_model)),              # ff W2
        init(ks[11], (1, d_model)),                 # ff b2
    ]
    return params


def reference(x, params):
    (a1, g1, wq, bq, wk, bk, wv, bv, wo, bo, a2, g2, w1, b1, w2, b2) = params
    D = x.shape[-1]
    dk = D // NHEAD

    def norm(t, alpha, beta):
        mean = jnp.mean(t, axis=-1, keepdims=True)
        std = jnp.std(t, axis=-1, keepdims=True, ddof=1)
        return alpha * (t - mean) / (std + EPS) + beta

    x2 = norm(x, a1, g1)
    q = x2 @ wq + bq
    k = x2 @ wk + bk
    v = x2 @ wv + bv
    B, S, _ = x.shape
    qh = q.reshape(B, S, NHEAD, dk).transpose(0, 2, 1, 3)
    kh = k.reshape(B, S, NHEAD, dk).transpose(0, 2, 1, 3)
    vh = v.reshape(B, S, NHEAD, dk).transpose(0, 2, 1, 3)
    s = jnp.einsum('bhqd,bhkd->bhqk', qh, kh) / math.sqrt(dk)
    p = jax.nn.softmax(s, axis=-1)
    ctx = jnp.einsum('bhqk,bhkd->bhqd', p, vh)
    concat = ctx.transpose(0, 2, 1, 3).reshape(B, S, D)
    x = x + (concat @ wo + bo)
    x2 = norm(x, a2, g2)
    ff = jnp.maximum(x2 @ w1 + b1, 0.0) @ w2 + b2
    return x + ff


if __name__ == "__main__":
    key = jax.random.PRNGKey(0)
    kx, kp = jax.random.split(key)

    B, S, D = 2, 8, D_MODEL
    x = jax.random.normal(kx, (B, S, D), dtype=jnp.float32)
    params = make_params(kp)

    out = jax.block_until_ready(trigo_encoder_layer(x, params))
    ref = reference(x, params)
    assert out.shape == (B, S, D)
    # bf16 MXU operands (f32 accumulation) vs. the all-f32 reference.
    assert jnp.allclose(out, ref, rtol=3e-2, atol=3e-2), (
        f"max abs err {jnp.max(jnp.abs(out - ref))}")

    # Also exercise the cdiv-grid / batch-padding path with an odd batch.
    xb = jax.random.normal(jax.random.PRNGKey(1), (5, S, D), dtype=jnp.float32)
    outb = jax.block_until_ready(trigo_encoder_layer(xb, params))
    refb = reference(xb, params)
    assert outb.shape == (5, S, D)
    assert jnp.allclose(outb, refb, rtol=3e-2, atol=3e-2), (
        f"max abs err {jnp.max(jnp.abs(outb - refb))}")

    print("KERNEL_OK")
</pallas_src>

<mosaic_0001>
module attributes {stable_mosaic.version = 11 : i64} {
  func.func @encoder_layer_kernel(%arg0: i32, %arg1: memref<1x8x32xf32, #tpu.memory_space<vmem>>, %arg2: memref<1x32xf32, #tpu.memory_space<vmem>>, %arg3: memref<1x32xf32, #tpu.memory_space<vmem>>, %arg4: memref<32x96xbf16, #tpu.memory_space<vmem>>, %arg5: memref<1x96xf32, #tpu.memory_space<vmem>>, %arg6: memref<32x32xbf16, #tpu.memory_space<vmem>>, %arg7: memref<1x32xf32, #tpu.memory_space<vmem>>, %arg8: memref<1x32xf32, #tpu.memory_space<vmem>>, %arg9: memref<1x32xf32, #tpu.memory_space<vmem>>, %arg10: memref<32x256xbf16, #tpu.memory_space<vmem>>, %arg11: memref<1x256xf32, #tpu.memory_space<vmem>>, %arg12: memref<256x32xbf16, #tpu.memory_space<vmem>>, %arg13: memref<1x32xf32, #tpu.memory_space<vmem>>, %arg14: memref<32x32xf32, #tpu.memory_space<vmem>>, %arg15: memref<32x32xf32, #tpu.memory_space<vmem>>, %arg16: memref<1x8x32xf32, #tpu.memory_space<vmem>>) attributes {dimension_semantics = [#tpu.dimension_semantics<parallel>], iteration_bounds = array<i64: 2>, scalar_prefetch = 0 : i64, scratch_operands = 0 : i64, tpu.core_type = #tpu.core_type<tc>, window_params = [{transform_indices = @transform_0, window_bounds = array<i64: 1, 8, 32>}, {pipeline_mode = #tpu.pipeline_mode<synchronous>, transform_indices = @transform_1, window_bounds = array<i64: 1, 32>}, {pipeline_mode = #tpu.pipeline_mode<synchronous>, transform_indices = @transform_2, window_bounds = array<i64: 1, 32>}, {pipeline_mode = #tpu.pipeline_mode<synchronous>, transform_indices = @transform_3, window_bounds = array<i64: 32, 96>}, {pipeline_mode = #tpu.pipeline_mode<synchronous>, transform_indices = @transform_4, window_bounds = array<i64: 1, 96>}, {pipeline_mode = #tpu.pipeline_mode<synchronous>, transform_indices = @transform_5, window_bounds = array<i64: 32, 32>}, {pipeline_mode = #tpu.pipeline_mode<synchronous>, transform_indices = @transform_6, window_bounds = array<i64: 1, 32>}, {pipeline_mode = #tpu.pipeline_mode<synchronous>, transform_indices = @transform_7, window_bounds = array<i64: 1, 32>}, {pipeline_mode = #tpu.pipeline_mode<synchronous>, transform_indices = @transform_8, window_bounds = array<i64: 1, 32>}, {pipeline_mode = #tpu.pipeline_mode<synchronous>, transform_indices = @transform_9, window_bounds = array<i64: 32, 256>}, {pipeline_mode = #tpu.pipeline_mode<synchronous>, transform_indices = @transform_10, window_bounds = array<i64: 1, 256>}, {pipeline_mode = #tpu.pipeline_mode<synchronous>, transform_indices = @transform_11, window_bounds = array<i64: 256, 32>}, {pipeline_mode = #tpu.pipeline_mode<synchronous>, transform_indices = @transform_12, window_bounds = array<i64: 1, 32>}, {pipeline_mode = #tpu.pipeline_mode<synchronous>, transform_indices = @transform_13, window_bounds = array<i64: 32, 32>}, {pipeline_mode = #tpu.pipeline_mode<synchronous>, transform_indices = @transform_14, window_bounds = array<i64: 32, 32>}, {transform_indices = @transform_15, window_bounds = array<i64: 1, 8, 32>}]} {
    %c0 = arith.constant 0 : index
    %c0_0 = arith.constant 0 : index
    %c0_1 = arith.constant 0 : index
    %0 = vector.load %arg1[%c0, %c0_0, %c0_1] : memref<1x8x32xf32, #tpu.memory_space<vmem>>, vector<1x8x32xf32>
    %1 = vector.shape_cast %0 : vector<1x8x32xf32> to vector<8x32xf32>
    %c0_2 = arith.constant 0 : index
    %c0_3 = arith.constant 0 : index
    %2 = vector.load %arg2[%c0_2, %c0_3] : memref<1x32xf32, #tpu.memory_space<vmem>>, vector<1x32xf32>
    %c0_4 = arith.constant 0 : index
    %c0_5 = arith.constant 0 : index
    %3 = vector.load %arg3[%c0_4, %c0_5] : memref<1x32xf32, #tpu.memory_space<vmem>>, vector<1x32xf32>
    %cst = arith.constant dense<0.000000e+00> : vector<8xf32>
    %4 = vector.multi_reduction <add>, %1, %cst [1] : vector<8x32xf32> to vector<8xf32>
    %5 = vector.shape_cast %4 : vector<8xf32> to vector<8x1xf32>
    %cst_6 = arith.constant 3.200000e+01 : f32
    %6 = vector.broadcast %cst_6 : f32 to vector<8x1xf32>
    %7 = arith.divf %5, %6 : vector<8x1xf32>
    %8 = vector.broadcast %7 : vector<8x1xf32> to vector<8x32xf32>
    %9 = arith.subf %1, %8 : vector<8x32xf32>
    %10 = arith.mulf %9, %9 : vector<8x32xf32>
    %cst_7 = arith.constant dense<0.000000e+00> : vector<8xf32>
    %11 = vector.multi_reduction <add>, %10, %cst_7 [1] : vector<8x32xf32> to vector<8xf32>
    %12 = vector.shape_cast %11 : vector<8xf32> to vector<8x1xf32>
    %cst_8 = arith.constant 0.0322580636 : f32
    %13 = vector.broadcast %cst_8 : f32 to vector<8x1xf32>
    %14 = arith.mulf %12, %13 : vector<8x1xf32>
    %15 = vector.broadcast %2 : vector<1x32xf32> to vector<8x32xf32>
    %16 = arith.mulf %15, %9 : vector<8x32xf32>
    %17 = math.sqrt %14 : vector<8x1xf32>
    %cst_9 = arith.constant 9.99999997E-7 : f32
    %18 = vector.broadcast %cst_9 : f32 to vector<8x1xf32>
    %19 = arith.addf %17, %18 : vector<8x1xf32>
    %20 = vector.broadcast %19 : vector<8x1xf32> to vector<8x32xf32>
    %21 = arith.divf %16, %20 : vector<8x32xf32>
    %22 = vector.broadcast %3 : vector<1x32xf32> to vector<8x32xf32>
    %23 = arith.addf %21, %22 : vector<8x32xf32>
    %24 = arith.truncf %23 : vector<8x32xf32> to vector<8x32xbf16>
    %c0_10 = arith.constant 0 : index
    %c0_11 = arith.constant 0 : index
    %25 = vector.load %arg4[%c0_10, %c0_11] : memref<32x96xbf16, #tpu.memory_space<vmem>>, vector<32x96xbf16>
    %cst_12 = arith.constant dense<0.000000e+00> : vector<8x96xf32>
    %26 = tpu.matmul %24, %25, %cst_12 {dimension_numbers = #tpu.dot_dimension_numbers<[1], [0], [0], [1], [0, 0, 1, 1], [], []>} : vector<8x32xbf16>, vector<32x96xbf16>, vector<8x96xf32> -> vector<8x96xf32>
    %c0_13 = arith.constant 0 : index
    %c0_14 = arith.constant 0 : index
    %27 = vector.load %arg5[%c0_13, %c0_14] : memref<1x96xf32, #tpu.memory_space<vmem>>, vector<1x96xf32>
    %28 = vector.broadcast %27 : vector<1x96xf32> to vector<8x96xf32>
    %29 = arith.addf %26, %28 : vector<8x96xf32>
    %30 = vector.extract_strided_slice %29 {offsets = [0, 0], sizes = [8, 32], strides = [1, 1]} : vector<8x96xf32> to vector<8x32xf32>
    %31 = vector.shape_cast %30 : vector<8x32xf32> to vector<1x8x32xf32>
    %32 = vector.extract_strided_slice %29 {offsets = [0, 32], sizes = [8, 32], strides = [1, 1]} : vector<8x96xf32> to vector<8x32xf32>
    %33 = vector.shape_cast %32 : vector<8x32xf32> to vector<1x8x32xf32>
    %34 = vector.extract_strided_slice %29 {offsets = [0, 64], sizes = [8, 32], strides = [1, 1]} : vector<8x96xf32> to vector<8x32xf32>
    %35 = vector.shape_cast %34 : vector<8x32xf32> to vector<1x8x32xf32>
    %c0_15 = arith.constant 0 : index
    %c0_16 = arith.constant 0 : index
    %36 = vector.load %arg14[%c0_15, %c0_16] : memref<32x32xf32, #tpu.memory_space<vmem>>, vector<32x32xf32>
    %37 = tpu.concatenate %33, %33, %33, %33 in 1 : vector<1x8x32xf32>, vector<1x8x32xf32>, vector<1x8x32xf32>, vector<1x8x32xf32> -> vector<1x32x32xf32>
    %38 = vector.shape_cast %36 : vector<32x32xf32> to vector<1x32x32xf32>
    %39 = arith.mulf %37, %38 : vector<1x32x32xf32>
    %40 = tpu.concatenate %35, %35, %35, %35 in 1 : vector<1x8x32xf32>, vector<1x8x32xf32>, vector<1x8x32xf32>, vector<1x8x32xf32> -> vector<1x32x32xf32>
    %41 = vector.shape_cast %36 : vector<32x32xf32> to vector<1x32x32xf32>
    %42 = arith.mulf %40, %41 : vector<1x32x32xf32>
    %43 = arith.truncf %31 : vector<1x8x32xf32> to vector<1x8x32xbf16>
    %44 = arith.truncf %39 : vector<1x32x32xf32> to vector<1x32x32xbf16>
    "tpu.trace_start"() <{level = 10 : i32, message = "bqd,bjd->bqj"}> : () -> ()
    %cst_17 = arith.constant dense<0.000000e+00> : vector<1x8x32xf32>
    %45 = tpu.matmul %43, %44, %cst_17 {dimension_numbers = #tpu.dot_dimension_numbers<[2], [2], [1], [1], [0, 0, 0, 1, 1, 1], [0], [0]>} : vector<1x8x32xbf16>, vector<1x32x32xbf16>, vector<1x8x32xf32> -> vector<1x8x32xf32>
    "tpu.trace_stop"() : () -> ()
    %cst_18 = arith.constant 0.353553385 : f32
    %46 = vector.broadcast %cst_18 : f32 to vector<1x8x32xf32>
    %47 = arith.mulf %45, %46 : vector<1x8x32xf32>
    %48 = vector.shape_cast %47 : vector<1x8x32xf32> to vector<8x32xf32>
    %cst_19 = arith.constant dense<0xFF800000> : vector<8xf32>
    %49 = vector.multi_reduction <maximumf>, %48, %cst_19 [1] : vector<8x32xf32> to vector<8xf32>
    %50 = vector.shape_cast %49 : vector<8xf32> to vector<8x1xf32>
    %51 = vector.broadcast %50 : vector<8x1xf32> to vector<8x32xf32>
    %52 = arith.subf %48, %51 : vector<8x32xf32>
    %53 = math.exp %52 : vector<8x32xf32>
    %c0_20 = arith.constant 0 : index
    %c0_21 = arith.constant 0 : index
    %54 = vector.load %arg15[%c0_20, %c0_21] : memref<32x32xf32, #tpu.memory_space<vmem>>, vector<32x32xf32>
    %cst_22 = arith.constant dense<0.000000e+00> : vector<8x32xf32>
    %55 = tpu.matmul %53, %54, %cst_22 {dimension_numbers = #tpu.dot_dimension_numbers<[1], [0], [0], [1], [0, 0, 1, 1], [], []>} : vector<8x32xf32>, vector<32x32xf32>, vector<8x32xf32> -> vector<8x32xf32>
    %cst_23 = arith.constant 1.000000e-30 : f32
    %56 = vector.broadcast %cst_23 : f32 to vector<8x32xf32>
    %57 = arith.maximumf %55, %56 : vector<8x32xf32>
    %58 = arith.divf %53, %57 : vector<8x32xf32>
    %59 = vector.shape_cast %58 : vector<8x32xf32> to vector<1x8x32xf32>
    %60 = arith.truncf %59 : vector<1x8x32xf32> to vector<1x8x32xbf16>
    %61 = arith.truncf %42 : vector<1x32x32xf32> to vector<1x32x32xbf16>
    "tpu.trace_start"() <{level = 10 : i32, message = "bqj,bjd->bqd"}> : () -> ()
    %cst_24 = arith.constant dense<0.000000e+00> : vector<1x8x32xf32>
    %62 = tpu.matmul %60, %61, %cst_24 {dimension_numbers = #tpu.dot_dimension_numbers<[2], [1], [1], [2], [0, 0, 0, 1, 1, 2], [0], [0]>} : vector<1x8x32xbf16>, vector<1x32x32xbf16>, vector<1x8x32xf32> -> vector<1x8x32xf32>
    "tpu.trace_stop"() : () -> ()
    %63 = vector.shape_cast %62 : vector<1x8x32xf32> to vector<8x32xf32>
    %64 = arith.truncf %63 : vector<8x32xf32> to vector<8x32xbf16>
    %c0_25 = arith.constant 0 : index
    %c0_26 = arith.constant 0 : index
    %65 = vector.load %arg6[%c0_25, %c0_26] : memref<32x32xbf16, #tpu.memory_space<vmem>>, vector<32x32xbf16>
    %cst_27 = arith.constant dense<0.000000e+00> : vector<8x32xf32>
    %66 = tpu.matmul %64, %65, %cst_27 {dimension_numbers = #tpu.dot_dimension_numbers<[1], [0], [0], [1], [0, 0, 1, 1], [], []>} : vector<8x32xbf16>, vector<32x32xbf16>, vector<8x32xf32> -> vector<8x32xf32>
    %c0_28 = arith.constant 0 : index
    %c0_29 = arith.constant 0 : index
    %67 = vector.load %arg7[%c0_28, %c0_29] : memref<1x32xf32, #tpu.memory_space<vmem>>, vector<1x32xf32>
    %68 = vector.broadcast %67 : vector<1x32xf32> to vector<8x32xf32>
    %69 = arith.addf %66, %68 : vector<8x32xf32>
    %70 = arith.addf %1, %69 : vector<8x32xf32>
    %c0_30 = arith.constant 0 : index
    %c0_31 = arith.constant 0 : index
    %71 = vector.load %arg8[%c0_30, %c0_31] : memref<1x32xf32, #tpu.memory_space<vmem>>, vector<1x32xf32>
    %c0_32 = arith.constant 0 : index
    %c0_33 = arith.constant 0 : index
    %72 = vector.load %arg9[%c0_32, %c0_33] : memref<1x32xf32, #tpu.memory_space<vmem>>, vector<1x32xf32>
    %cst_34 = arith.constant dense<0.000000e+00> : vector<8xf32>
    %73 = vector.multi_reduction <add>, %70, %cst_34 [1] : vector<8x32xf32> to vector<8xf32>
    %74 = vector.shape_cast %73 : vector<8xf32> to vector<8x1xf32>
    %cst_35 = arith.constant 3.200000e+01 : f32
    %75 = vector.broadcast %cst_35 : f32 to vector<8x1xf32>
    %76 = arith.divf %74, %75 : vector<8x1xf32>
    %77 = vector.broadcast %76 : vector<8x1xf32> to vector<8x32xf32>
    %78 = arith.subf %70, %77 : vector<8x32xf32>
    %79 = arith.mulf %78, %78 : vector<8x32xf32>
    %cst_36 = arith.constant dense<0.000000e+00> : vector<8xf32>
    %80 = vector.multi_reduction <add>, %79, %cst_36 [1] : vector<8x32xf32> to vector<8xf32>
    %81 = vector.shape_cast %80 : vector<8xf32> to vector<8x1xf32>
    %cst_37 = arith.constant 0.0322580636 : f32
    %82 = vector.broadcast %cst_37 : f32 to vector<8x1xf32>
    %83 = arith.mulf %81, %82 : vector<8x1xf32>
    %84 = vector.broadcast %71 : vector<1x32xf32> to vector<8x32xf32>
    %85 = arith.mulf %84, %78 : vector<8x32xf32>
    %86 = math.sqrt %83 : vector<8x1xf32>
    %cst_38 = arith.constant 9.99999997E-7 : f32
    %87 = vector.broadcast %cst_38 : f32 to vector<8x1xf32>
    %88 = arith.addf %86, %87 : vector<8x1xf32>
    %89 = vector.broadcast %88 : vector<8x1xf32> to vector<8x32xf32>
    %90 = arith.divf %85, %89 : vector<8x32xf32>
    %91 = vector.broadcast %72 : vector<1x32xf32> to vector<8x32xf32>
    %92 = arith.addf %90, %91 : vector<8x32xf32>
    %93 = arith.truncf %92 : vector<8x32xf32> to vector<8x32xbf16>
    %c0_39 = arith.constant 0 : index
    %c0_40 = arith.constant 0 : index
    %94 = vector.load %arg10[%c0_39, %c0_40] : memref<32x256xbf16, #tpu.memory_space<vmem>>, vector<32x256xbf16>
    %cst_41 = arith.constant dense<0.000000e+00> : vector<8x256xf32>
    %95 = tpu.matmul %93, %94, %cst_41 {dimension_numbers = #tpu.dot_dimension_numbers<[1], [0], [0], [1], [0, 0, 1, 1], [], []>} : vector<8x32xbf16>, vector<32x256xbf16>, vector<8x256xf32> -> vector<8x256xf32>
    %c0_42 = arith.constant 0 : index
    %c0_43 = arith.constant 0 : index
    %96 = vector.load %arg11[%c0_42, %c0_43] : memref<1x256xf32, #tpu.memory_space<vmem>>, vector<1x256xf32>
    %97 = vector.broadcast %96 : vector<1x256xf32> to vector<8x256xf32>
    %98 = arith.addf %95, %97 : vector<8x256xf32>
    %cst_44 = arith.constant 0.000000e+00 : f32
    %99 = vector.broadcast %cst_44 : f32 to vector<8x256xf32>
    %100 = arith.maximumf %98, %99 : vector<8x256xf32>
    %101 = arith.truncf %100 : vector<8x256xf32> to vector<8x256xbf16>
    %c0_45 = arith.constant 0 : index
    %c0_46 = arith.constant 0 : index
    %102 = vector.load %arg12[%c0_45, %c0_46] : memref<256x32xbf16, #tpu.memory_space<vmem>>, vector<256x32xbf16>
    %cst_47 = arith.constant dense<0.000000e+00> : vector<8x32xf32>
    %103 = tpu.matmul %101, %102, %cst_47 {dimension_numbers = #tpu.dot_dimension_numbers<[1], [0], [0], [1], [0, 0, 1, 1], [], []>} : vector<8x256xbf16>, vector<256x32xbf16>, vector<8x32xf32> -> vector<8x32xf32>
    %c0_48 = arith.constant 0 : index
    %c0_49 = arith.constant 0 : index
    %104 = vector.load %arg13[%c0_48, %c0_49] : memref<1x32xf32, #tpu.memory_space<vmem>>, vector<1x32xf32>
    %105 = vector.broadcast %104 : vector<1x32xf32> to vector<8x32xf32>
    %106 = arith.addf %103, %105 : vector<8x32xf32>
    %107 = arith.addf %70, %106 : vector<8x32xf32>
    %108 = vector.shape_cast %107 : vector<8x32xf32> to vector<1x8x32xf32>
    %c0_50 = arith.constant 0 : index
    %c0_51 = arith.constant 0 : index
    %c0_52 = arith.constant 0 : index
    %109 = vector.load %arg16[%c0_50, %c0_51, %c0_52] : memref<1x8x32xf32, #tpu.memory_space<vmem>>, vector<1x8x32xf32>
    tpu.vector_store %arg16[%c0_50, %c0_51, %c0_52], %108 {strides = array<i32>} : memref<1x8x32xf32, #tpu.memory_space<vmem>>, vector<1x8x32xf32>,
    return
  }
  func.func @transform_0(%arg0: i32) -> (i32, i32, i32) {
    %c0_i32 = arith.constant 0 : i32
    %c0_i32_0 = arith.constant 0 : i32
    %c0_i32_1 = arith.constant 0 : i32
    return %arg0, %c0_i32, %c0_i32_0 : i32, i32, i32
  }
  func.func @transform_1(%arg0: i32) -> (i32, i32) {
    %c0_i32 = arith.constant 0 : i32
    %c0_i32_0 = arith.constant 0 : i32
    %c0_i32_1 = arith.constant 0 : i32
    return %c0_i32, %c0_i32_0 : i32, i32
  }
  func.func @transform_2(%arg0: i32) -> (i32, i32) {
    %c0_i32 = arith.constant 0 : i32
    %c0_i32_0 = arith.constant 0 : i32
    %c0_i32_1 = arith.constant 0 : i32
    return %c0_i32, %c0_i32_0 : i32, i32
  }
  func.func @transform_3(%arg0: i32) -> (i32, i32) {
    %c0_i32 = arith.constant 0 : i32
    %c0_i32_0 = arith.constant 0 : i32
    %c0_i32_1 = arith.constant 0 : i32
    return %c0_i32, %c0_i32_0 : i32, i32
  }
  func.func @transform_4(%arg0: i32) -> (i32, i32) {
    %c0_i32 = arith.constant 0 : i32
    %c0_i32_0 = arith.constant 0 : i32
    %c0_i32_1 = arith.constant 0 : i32
    return %c0_i32, %c0_i32_0 : i32, i32
  }
  func.func @transform_5(%arg0: i32) -> (i32, i32) {
    %c0_i32 = arith.constant 0 : i32
    %c0_i32_0 = arith.constant 0 : i32
    %c0_i32_1 = arith.constant 0 : i32
    return %c0_i32, %c0_i32_0 : i32, i32
  }
  func.func @transform_6(%arg0: i32) -> (i32, i32) {
    %c0_i32 = arith.constant 0 : i32
    %c0_i32_0 = arith.constant 0 : i32
    %c0_i32_1 = arith.constant 0 : i32
    return %c0_i32, %c0_i32_0 : i32, i32
  }
  func.func @transform_7(%arg0: i32) -> (i32, i32) {
    %c0_i32 = arith.constant 0 : i32
    %c0_i32_0 = arith.constant 0 : i32
    %c0_i32_1 = arith.constant 0 : i32
    return %c0_i32, %c0_i32_0 : i32, i32
  }
  func.func @transform_8(%arg0: i32) -> (i32, i32) {
    %c0_i32 = arith.constant 0 : i32
    %c0_i32_0 = arith.constant 0 : i32
    %c0_i32_1 = arith.constant 0 : i32
    return %c0_i32, %c0_i32_0 : i32, i32
  }
  func.func @transform_9(%arg0: i32) -> (i32, i32) {
    %c0_i32 = arith.constant 0 : i32
    %c0_i32_0 = arith.constant 0 : i32
    %c0_i32_1 = arith.constant 0 : i32
    return %c0_i32, %c0_i32_0 : i32, i32
  }
  func.func @transform_10(%arg0: i32) -> (i32, i32) {
    %c0_i32 = arith.constant 0 : i32
    %c0_i32_0 = arith.constant 0 : i32
    %c0_i32_1 = arith.constant 0 : i32
    return %c0_i32, %c0_i32_0 : i32, i32
  }
  func.func @transform_11(%arg0: i32) -> (i32, i32) {
    %c0_i32 = arith.constant 0 : i32
    %c0_i32_0 = arith.constant 0 : i32
    %c0_i32_1 = arith.constant 0 : i32
    return %c0_i32, %c0_i32_0 : i32, i32
  }
  func.func @transform_12(%arg0: i32) -> (i32, i32) {
    %c0_i32 = arith.constant 0 : i32
    %c0_i32_0 = arith.constant 0 : i32
    %c0_i32_1 = arith.constant 0 : i32
    return %c0_i32, %c0_i32_0 : i32, i32
  }
  func.func @transform_13(%arg0: i32) -> (i32, i32) {
    %c0_i32 = arith.constant 0 : i32
    %c0_i32_0 = arith.constant 0 : i32
    %c0_i32_1 = arith.constant 0 : i32
    return %c0_i32, %c0_i32_0 : i32, i32
  }
  func.func @transform_14(%arg0: i32) -> (i32, i32) {
    %c0_i32 = arith.constant 0 : i32
    %c0_i32_0 = arith.constant 0 : i32
    %c0_i32_1 = arith.constant 0 : i32
    return %c0_i32, %c0_i32_0 : i32, i32
  }
  func.func @transform_15(%arg0: i32) -> (i32, i32, i32) {
    %c0_i32 = arith.constant 0 : i32
    %c0_i32_0 = arith.constant 0 : i32
    %c0_i32_1 = arith.constant 0 : i32
    return %arg0, %c0_i32, %c0_i32_0 : i32, i32, i32
  }
}

</mosaic_0001>

<bundles_post_ra>
// kernel: tpu_custom_call.1
= control target key start
LH: loop header
LB: loop body
LE: loop exit
PB: predicated region body
PF: predicated region fallthrough
CT: control target
= control target key end

     0   :  { %s1895_s0 = inlined_call_operand.vmem [shape: f32[2,8,32], index: 0, kind: input, shape index: {}]   ;;  %s1896_s1 = inlined_call_operand.vmem [shape: f32[1,32], index: 1, kind: input, shape index: {}]   ;;  %s1897_s2 = inlined_call_operand.vmem [shape: f32[1,32], index: 2, kind: input, shape index: {}]   ;;  %s1898_s3 = inlined_call_operand.vmem [shape: bf16[32,96], index: 3, kind: input, shape index: {}]   ;;  %s1899_s4 = inlined_call_operand.vmem [shape: f32[1,96], index: 4, kind: input, shape index: {}]   ;;  %s1900_s5 = inlined_call_operand.vmem [shape: bf16[32,32], index: 5, kind: input, shape index: {}]   ;;  %s1901_s6 = inlined_call_operand.vmem [shape: f32[1,32], index: 6, kind: input, shape index: {}]   ;;  %s1902_s7 = inlined_call_operand.vmem [shape: f32[1,32], index: 7, kind: input, shape index: {}]   ;;  %s1903_s8 = inlined_call_operand.vmem [shape: f32[1,32], index: 8, kind: input, shape index: {}]   ;;  %s1904_s9 = inlined_call_operand.vmem [shape: bf16[32,256], index: 9, kind: input, shape index: {}]   ;;  %s1905_s10 = inlined_call_operand.vmem [shape: f32[1,256], index: 10, kind: input, shape index: {}]   ;;  %s1906_s11 = inlined_call_operand.vmem [shape: bf16[256,32], index: 11, kind: input, shape index: {}]   ;;  %s1907_s12 = inlined_call_operand.vmem [shape: f32[1,32], index: 12, kind: input, shape index: {}]   ;;  %s1908_s13 = inlined_call_operand.vmem [shape: f32[32,32], index: 13, kind: input, shape index: {}]   ;;  %s1909_s14 = inlined_call_operand.vmem [shape: f32[32,32], index: 14, kind: input, shape index: {}]   ;;  %s1910_s15 = inlined_call_operand.hbm [shape: f32[2,8,32], index: 15, kind: output, shape index: {}]  }
   0x1   :  { %1912 = sst [smem:[#allocation7_spill]] %s1895_s0 }
   0x2   :  { %1913 = sst [smem:[#allocation8_spill]] %s1896_s1 }
   0x3   :  { %1914 = sst [smem:[#allocation9_spill]] %s1897_s2 }
   0x4   :  { %1915 = sst [smem:[#allocation10_spill]] %s1898_s3 }
   0x5   :  { %20 = vsyncpa [#allocation3], 0 }
   0x6   :  { %22 = vsyncpa [#allocation3 + $0x1], 0  ;;  %s1636_s18 = smov 0   ;;  %s1638_s19 = smov 0  }
   0x7   :  { %s1640_s20 = smov 0   ;;  %s1642_s21 = smov 0  }
   0x8 LB: > { %1916 = sst [smem:[#allocation5_spill]] %s1543_s20  ;;  %s1657_s22 = sadd.s32 4294967295, %s1547_s21   ;;  %s1547_s21 = sphi %s1642_s21, %s1928_s21   ;;  %s1543_s20 = sphi %s1640_s20, %s1925_s20   ;;  %s1539_s19 = sphi %s1638_s19, %s1927_s19   ;;  %s1535_s18 = sphi %s1636_s18, %s1926_s18  }
   0x9   : > { %s1275_s23 = sadd.s32 4294967294, %s1547_s21   ;;  %s1661_s24 = sadd.s32 1, %s1547_s21  }
   0xa   : > { %s355_s25 = sadd.s32 1, %s1543_s20  ;;  %s352_s26 = ssub.s32 %s1547_s21, %s1661_s24 }
   0xb   : > { %p365_p0 = scmp.ne.s32.totalorder %s1543_s20, %s1539_s19  ;;  %p353_p1 = scmp.eq.s32.totalorder %s352_s26, 0 }
   0xc   : > { %p366_p2 = scmp.eq.s32.totalorder %s1657_s22, 1  ;;  %p371_p3 = scmp.ne.s32.totalorder %s1539_s19, %s1535_s18 }
   0xd   : > { %p372_p4 = scmp.eq.s32.totalorder %s1275_s23, 1  ;;  %p1278_p7 = scmp.ge.s32.totalorder %s1547_s21, 1 }
   0xe   : > { %s1672_s27 = scalar_select %p353_p1, %s1543_s20, %s355_s25  }
   0xf   : > { %p1674_p5 = por %p366_p2, %p365_p0  ;;  %p1678_p6 = por %p372_p4, %p371_p3 }
  0x10   : > { %1917 = sst [smem:[#allocation6_spill]] %s1672_s27  ;;  %p439_p8 = scmp.lt.s32.totalorder %s1547_s21, 3 }
  0x12   : > { %p440_p9 = pnand %p1278_p7, %p439_p8 }
  0x13   : > { %p486_p10 = scmp.lt.s32.totalorder (!%p440_p9), %s1657_s22, 1  ;;  %s1920_s0 = sld [smem:[#allocation7_spill]] (!%p440_p9) }
  0x14   : > { %443 = sbr.rel (%p440_p9) target bundleno = 2385 (0x951), region = 80  ;;  %s1921_s3 = sld [smem:[#allocation10_spill]] (!%p440_p9) }
  0x15   : > { %s1922_s1 = sld [smem:[#allocation8_spill]] (!%p440_p9)  ;;  %s1319_s20 = sshll.u32 (!%p440_p9), %s1657_s22, 7 }
  0x16   : > { %s1923_s2 = sld [smem:[#allocation9_spill]] (!%p440_p9) }
  0x19   : > { %s487_s30 = scalar_select %p486_p10, %s1657_s22, 1  ;;  %vm494_vm0 = vcmask 261120   ;;  %v1549_v8 = vmov 0.0   ;;  %vm1550_vm1 = vmmov 0   ;;  %v597_v10 = vld [vmem:[%s1908_s13] sm:$0xff]  ;;  %v599_v11 = vld [vmem:[%s1908_s13 + $0x10] sm:$0xff] }
  0x1a   : > { %v1449_v7 = vld [vmem:[%s1921_s3 + $0x8] sm:$0xff]   ;;  %1361 = vmatprep.subr.bf16.mxu0 %v1549_v8  ;;  %1365 = vmatprep.mubr.msk.bf16.mxu0 %vm1550_vm1, %v1549_v8  ;;  %v1450_v9 = vld [vmem:[%s1921_s3] sm:$0xff]   ;;  %v600_v12 = vld [vmem:[%s1908_s13 + $0x18] sm:$0xff]  ;;  %s1552_s3 = smov 64   ;;  %s1555_s22 = smov [#allocation2]  }
  0x1b   : > { %s1280_s16 = sshll.u32 %s487_s30, 3  ;;  %1362 = vmatpush3.bf16.msra.mxu0 %v1449_v7  ;;  %1396 = vmatprep.subr.bf16.mxu1 %v1549_v8  ;;  %v598_v13 = vld [vmem:[%s1908_s13 + $0x8] sm:$0xff]  ;;  %v1281_v22 = vld [vmem:[%s1922_s1] ss:$0 sm:$0xff]  ;;  %s1553_s30 = smov 96  }
  0x1c   : > { %s489_s25 = scalar_lea.vmem %s1920_s0, %s1280_s16  ;;  %1363 = vmatprep.subr.bf16.mxu0 %v1549_v8  ;;  %1400 = vmatprep.mubr.msk.bf16.mxu1 %vm1550_vm1, %v1549_v8  ;;  %s1551_s16 = smov 32   ;;  %v1282_v25 = vld [vmem:[%s1923_s2] ss:$0 sm:$0xff] }
  0x1d   : > { %v1689_v0 = vld [vmem:[%s489_s25] sm:$0xff]  ;;  %609 = vrot.lane.b32.xlu1 %v599_v11, %s1551_s16 }
  0x1e   : > { %v495_v1 = vsel %vm494_vm0, %v1689_v0, 0.0  ;;  %v1283_v35 = vld [vmem:[%s1899_s4] ss:$0 sm:$0xff] }
  0x1f   : > { %496 = vadd.xlane.f32.xlu0 %v495_v1  ;;  %1364 = vmatpush3.bf16.msra.mxu0 %v1450_v9 }
  0x20   : > { %1369 = vmatprep.subr.bf16.mxu0 %v1549_v8 }
  0x21   : > { %611 = vrot.lane.b32.xlu1 %v600_v12, %s1551_s16 }
  0x25   : > { %607 = vrot.lane.b32.xlu1 %v598_v13, %s1551_s16 }
  0x8f   : > { %v610_v31 = vpop.permute.xlu1 %609 }
  0x93   : > { %v612_v33 = vpop.permute.xlu1 %611 }
  0x97   : > { %v608_v38 = vpop.permute.xlu1 %607 }
  0xa8   : > { %v497_v2 = vpop.xlane.xlu0 %496 }
  0xa9   : > { %v499_v3 = vmul.f32 0.03125, %v497_v2 }
  0xab   : > { %v500_v4 = vsub.f32 %v1689_v0, %v499_v3  ;;  %v705_v3 = vld [vmem:[%s1909_s14 + $0x18] sm:$0xff] }
  0xad   : > { %v501_v5 = vmul.f32 %v500_v4, %v500_v4  ;;  %v512_v23 = vmul.f32 %v1281_v22, %v500_v4  ;;  %v704_v4 = vld [vmem:[%s1909_s14 + $0x10] sm:$0xff] }
  0xaf   : > { %v502_v6 = vsel %vm494_vm0, %v501_v5, 0.0  ;;  %v703_v5 = vld [vmem:[%s1909_s14 + $0x8] sm:$0xff] }
  0xb0   : > { %503 = vadd.xlane.f32.xlu0 %v502_v6  ;;  %v702_v6 = vld [vmem:[%s1909_s14] sm:$0xff] }
  0xc6   : > { %605 = vrot.lane.b32.xlu0 %v597_v10, %s1551_s16 }
  0xca   : > { %625 = vrot.lane.b32.xlu0 %v599_v11, %s1552_s3 }
  0xce   : > { %627 = vrot.lane.b32.xlu0 %v600_v12, %s1552_s3 }
  0xd2   : > { %621 = vrot.lane.b32.xlu0 %v597_v10, %s1552_s3 }
  0xd6   : > { %623 = vrot.lane.b32.xlu0 %v598_v13, %s1552_s3 }
 0x139   : > { %v504_v14 = vpop.xlane.xlu0 %503 }
 0x13a   : > { %v505_v15 = vmul.f32 0.032258064, %v504_v14  ;;  %v1451_v14 = vld [vmem:[%s1900_s5 + $0x8] sm:$0xff]  }
 0x13b   : > { %1397 = vmatpush3.bf16.msra.mxu1 %v1451_v14 }
 0x13c   : > { %1475 = vrsqrt.f32 %v505_v15  ;;  %vm515_vm2 = vcmp.eq.f32.partialorder %v505_v15, inf  ;;  %v518_v18 = vand.u32 2147483648, %v505_v15  ;;  %vm517_vm3 = vcmp.eq.f32.partialorder %v505_v15, 0.0  ;;  %1398 = vmatprep.subr.bf16.mxu1 %v1549_v8 }
 0x13d   : > { %v606_v29 = vpop.permute.xlu0 %605 }
 0x141   : > { %v626_v30 = vpop.permute.xlu0 %625 }
 0x145   : > { %v628_v32 = vpop.permute.xlu0 %627 }
 0x149   : > { %v1476_v16 = vpop.eup %1475  ;;  %v622_v34 = vpop.permute.xlu0 %621 }
 0x14a   : > { %v514_v17 = vmul.f32 %v1476_v16, %v505_v15 }
 0x14c   : > { %v516_v19 = vsel %vm515_vm2, %v505_v15, %v514_v17 }
 0x14d   : > { %v519_v20 = vsel %vm517_vm3, %v518_v18, %v516_v19  ;;  %v624_v40 = vpop.permute.xlu0 %623 }
 0x14e   : > { %v520_v21 = vadd.f32 1e-06, %v519_v20 }
 0x150   : > { %1477 = vrcp.f32 %v520_v21  ;;  %v1452_v21 = vld [vmem:[%s1900_s5] sm:$0xff]  }
 0x151   : > { %1399 = vmatpush3.bf16.msra.mxu1 %v1452_v21 }
 0x15d   : > { %v1478_v24 = vpop.eup %1477 }
 0x15e   : > { %v522_v26 = vmul.f32 %v1478_v24, %v512_v23 }
 0x160   : > { %v529_v27 = vadd.f32 %v1282_v25, %v522_v26  ;;  %v1290_v26 = vld [vmem:[%s1901_s6] ss:$0 sm:$0xff] }
 0x162   : > { %v530_v28 = vpack.c.bf16 %v529_v27, %v529_v27 }
 0x164   : > { %1366 = vmatmul.mubr.msk.bf16.vlgmr.msra.gmra.mxu0 %vm494_vm0, %v530_v28 }
 0x165   : > { %1373 = vmatprep.mubr.msk.bf16.mxu0 %vm1550_vm1, %v1549_v8 }
 0x224   : > { %v591_v36 = vpop.f32.mrf.mxu0 }
 0x225   : > { %v592_v37 = vadd.f32 %v1283_v35, %v591_v36 }
 0x226   : > { %v1367_v39 = vpop.f32.mrf.mxu0 }
 0x227   : > { %v619_v42 = vmul.f32 %v610_v31, %v592_v37  ;;  %v620_v43 = vmul.f32 %v612_v33, %v592_v37  ;;  %v635_v44 = vmul.f32 %v626_v30, %v592_v37  ;;  %v636_v45 = vmul.f32 %v628_v32, %v592_v37  ;;  %v1453_v39 = vld [vmem:[%s1904_s9 + $0x10] ss:$8 sps:$4 sm:$0xff]  }
 0x228   : > { %v594_v41 = vpop.f32.mrf.mxu0  ;;  %v617_v46 = vmul.f32 %v606_v29, %v592_v37  ;;  %v618_v47 = vmul.f32 %v608_v38, %v592_v37  ;;  %v633_v48 = vmul.f32 %v622_v34, %v592_v37  ;;  %v634_v49 = vmul.f32 %v624_v40, %v592_v37  ;;  %v1458_v40 = vld [vmem:[%s1904_s9 + $0x4] ss:$8 sps:$4 sm:$0xff]  }
 0x229   : > { %v639_v51 = vpack.c.bf16 %v620_v43, %v619_v42  ;;  %v784_v52 = vpack.c.bf16 %v636_v45, %v635_v44  ;;  %v637_v59 = vpack.c.bf16 %v592_v37, %v592_v37  ;;  %v1554_v41 = vmov 0   ;;  %v1456_v42 = vld [vmem:[%s1904_s9] ss:$8 sps:$4 sm:$0xff]   ;;  %v1459_v43 = vld [vmem:[%s1906_s11 + $0x78] sm:$0xff]   ;;  %v1461_v45 = vld [vmem:[%s1906_s11 + $0x70] sm:$0xff]  }
 0x22a   : > { %v1368_v50 = vpop.f32.mrf.mxu0  ;;  %v638_v53 = vpack.c.bf16 %v618_v47, %v617_v46  ;;  %v783_v54 = vpack.c.bf16 %v634_v49, %v633_v48  ;;  %v1460_v44 = vld [vmem:[%s1906_s11 + $0x38] sm:$0xff]   ;;  %1339 = vmatprep.subr.bf16.mxu1 %v1459_v43  ;;  %v1462_v46 = vld [vmem:[%s1906_s11 + $0x30] sm:$0xff]   ;;  %v1463_v47 = vld [vmem:[%s1906_s11 + $0x68] sm:$0xff]  }
 0x22b   : > { %644 = vrot.lane.b32.xlu1 %v639_v51, %s1553_s30  ;;  %789 = vrot.lane.b32.xlu0 %v784_v52, %s1552_s3  ;;  %v1464_v48 = vld [vmem:[%s1906_s11 + $0x28] sm:$0xff]   ;;  %v1465_v49 = vld [vmem:[%s1906_s11 + $0x60] sm:$0xff]  }
 0x22c   : > { %v1466_v50 = vld [vmem:[%s1906_s11 + $0x20] sm:$0xff]   ;;  %v1467_v51 = vld [vmem:[%s1906_s11 + $0x58] sm:$0xff]  }
 0x22d   : > { %v1468_v52 = vld [vmem:[%s1906_s11 + $0x18] sm:$0xff]  }
 0x22f   : > { %642 = vrot.lane.b32.xlu1 %v638_v53, %s1553_s30  ;;  %787 = vrot.lane.b32.xlu0 %v783_v54, %s1552_s3  ;;  %v1469_v53 = vld [vmem:[%s1906_s11 + $0x50] sm:$0xff]   ;;  %s483_s3 = sand.u32 1, %s1539_s19   ;;  %s1214_s30 = scalar_lea.hbm %s1910_s15, %s1319_s20 }
 0x230   : > { %v1470_v54 = vld [vmem:[%s1906_s11 + $0x10] sm:$0xff]   ;;  %s1279_s16 = sshll.u32 %s483_s3, 3  ;;  %s1203_s17 = scalar_lea.sflag [#allocation3], %s483_s3 }
 0x231   : > { %s485_s27 = scalar_lea.vmem [#allocation2], %s1279_s16  ;;  %s1491_s16 = sshll.u32 %s1555_s22, 4  ;;  %s1492_s16 = int_to_ptr.vmem [resolvable:$false] %s1491_s16 }
 0x232   : > { %s1216_s23 = sshll.u32 %s485_s27, 4  ;;  %s1493_s1 = scalar_lea.vmem %s1492_s16, 256  ;;  %s1217_s23 = int_to_ptr.vmem [resolvable:$true] %s1216_s23 }
 0x233   : > { %s1487_s0 = scalar_lea.vmem %s1217_s23, 128  ;;  %p1494_p0 = scmp.lt.s32.totalorder %s1217_s23, %s1492_s16 }
 0x234   : > { %p1488_p11 = scmp.ne.s32.totalorder %s1217_s23, %s1487_s0  ;;  %p1495_p1 = scmp.lt.s32.totalorder %s1493_s1, %s1487_s0 }
 0x236   : > { %p1489_p12 = pnand %p1488_p11, %p1674_p5  ;;  %p1496_p2 = por %p1495_p1, %p1494_p0 }
 0x238   : > { %p1490_p13 = pneg %p1489_p12 }
 0x23a   : > { %p1497_p3 = pnand %p1496_p2, %p1490_p13 }
 0x29d   : > { %v645_v55 = vpop.permute.xlu1 %644  ;;  %v790_v11 = vpop.permute.xlu0 %789 }
 0x29e   : > { %v653_v56 = vsel %vm494_vm0, %v645_v55, 0 }
 0x29f   : > { %1370 = vmatpush3.bf16.xpose.msra.mxu0 %v653_v56 }
 0x2a0   : > { %1371 = vmatprep.subr.bf16.mxu0 %v1549_v8 }
 0x2a1   : > { %v643_v57 = vpop.permute.xlu1 %642  ;;  %v788_v13 = vpop.permute.xlu0 %787 }
 0x2a2   : > { %v650_v58 = vsel %vm494_vm0, %v643_v57, 0 }
 0x2a7   : > { %1372 = vmatpush3.bf16.xpose.msra.mxu0 %v650_v58 }
 0x2a8   : > { %1377 = vmatprep.subr.mxu0 %v1549_v8 }
 0x2ae   : > { %1374 = vmatmul.mubr.msk.bf16.vlgmr.msra.gmra.mxu0 %vm494_vm0, %v637_v59 }
 0x2af   : > { %1385 = vmatprep.mubr.msk.f32.mxu0 %vm1550_vm1, %v1549_v8  ;;  %1378 = vmatpush3.msra.mxu0 %v705_v3  ;;  %v1295_v3 = vld [vmem:[%s1903_s8] ss:$0 sm:$0xff] }
 0x2b0   : > { %1379 = vmatprep.subr.mxu0 %v1549_v8 }
 0x2b1   : > { %1380 = vmatpush3.msra.mxu0 %v704_v4 }
 0x2b2   : > { %1381 = vmatprep.subr.mxu0 %v1549_v8 }
 0x2b3   : > { %1382 = vmatpush3.msra.mxu0 %v703_v5 }
 0x2b4   : > { %1383 = vmatprep.subr.mxu0 %v1549_v8 }
 0x2b5   : > { %1384 = vmatpush3.msra.mxu0 %v702_v6 }
 0x2b6   : > { %1388 = vmatprep.subr.bf16.mxu0 %v1549_v8 }
 0x36e   : > { %v689_v60 = vpop.f32.mrf.mxu0 }
 0x36f   : > { %v695_v61 = vmul.f32 0.35355338, %v689_v60 }
 0x370   : > { %v1375_v62 = vpop.f32.mrf.mxu0 }
 0x371   : > { %v696_v63 = vsel %vm494_vm0, %v695_v61, -inf }
 0x372   : > { %697 = vmax.xlane.f32.xlu1 %v696_v63  ;;  %v692_v1 = vpop.f32.mrf.mxu0  ;;  %v1294_v63 = vld [vmem:[%s1902_s7] ss:$0 sm:$0xff] }
 0x374   : > { %v1376_v2 = vpop.f32.mrf.mxu0 }
 0x3fb   : > { %v698_v7 = vpop.xlane.xlu1 %697 }
 0x3fc   : > { %v699_v9 = vsub.f32 %v695_v61, %v698_v7  ;;  %v1471_v7 = vld [vmem:[%s1906_s11 + $0x48] sm:$0xff]  }
 0x3fe   : > { %v700_v10 = vmul.f32 1.442695, %v699_v9  ;;  %v1472_v9 = vld [vmem:[%s1906_s11 + $0x8] sm:$0xff]  }
 0x400   : > { %1479 = vpow2.f32 %v700_v10  ;;  %v1473_v10 = vld [vmem:[%s1906_s11 + $0x40] sm:$0xff]  }
 0x40d   : > { %v1480_v12 = vpop.eup %1479 }
 0x40e   : > { %1386 = vmatmul.mubr.msk.f32.vlgmr.msra.gmra.mxu0 %vm494_vm0, %v1480_v12 }
 0x40f   : > { %1389 = vmatpush3.bf16.msra.mxu0 %v790_v11  ;;  %1392 = vmatprep.mubr.msk.bf16.mxu0 %vm1550_vm1, %v1549_v8  ;;  %v1474_v11 = vld [vmem:[%s1906_s11] sm:$0xff]  }
 0x410   : > { %1390 = vmatprep.subr.bf16.mxu0 %v1549_v8 }
 0x413   : > { %1391 = vmatpush3.bf16.msra.mxu0 %v788_v13 }
 0x4ce   : > { %v775_v15 = vpop.f32.mrf.mxu0 }
 0x4cf   : > { %v779_v16 = vmax.f32 %v775_v15, 1e-30  ;;  %v945_v15 = vld [vmem:[%s1905_s10] sm:$0x3] }
 0x4d0   : > { %v1387_v17 = vpop.f32.mrf.mxu0 }
 0x4d1   : > { %1481 = vrcp.f32 %v779_v16 }
 0x4de   : > { %v1482_v18 = vpop.eup %1481 }
 0x4df   : > { %v781_v19 = vmul.f32 %v1482_v18, %v1480_v12  ;;  %v947_v12 = vlaneseq }
 0x4e1   : > { %v782_v20 = vpack.c.bf16 %v781_v19, %v781_v19  ;;  %v948_v13 = vshrl.u32 %v947_v12, 7 }
 0x4e3   : > { %1393 = vmatmul.mubr.msk.bf16.vlgmr.msra.gmra.mxu0 %vm494_vm0, %v782_v20  ;;  %v949_v14 = vsub.s32 0, %v948_v13  ;;  %v953_v16 = vsub.s32 1, %v948_v13 }
 0x4e4   : > { %1012 = vmatprep.mubr.bf16.mxu0 %v1554_v41 }
 0x4e5   : > { %v950_v17 = vrot.slane %v945_v15, %v949_v14  ;;  %v954_v18 = vrot.slane %v945_v15, %v953_v16 }
 0x5a3   : > { %v830_v22 = vpop.f32.mrf.mxu0 }
 0x5a4   : > { %v836_v23 = vpack.c.bf16 %v830_v22, %v830_v22 }
 0x5a5   : > { %v1394_v24 = vpop.f32.mrf.mxu0 }
 0x5a6   : > { %1401 = vmatmul.mubr.msk.bf16.vlgmr.msra.gmra.mxu1 %vm494_vm0, %v836_v23 }
 0x5a7   : > { %v833_v8 = vpop.f32.mrf.mxu0  ;;  %1340 = vmatpush3.bf16.msra.mxu1 %v1460_v44 }
 0x5a8   : > { %1341 = vmatprep.subr.bf16.mxu1 %v1461_v45 }
 0x5a9   : > { %v1395_v25 = vpop.f32.mrf.mxu0 }
 0x5ab   : > { %1342 = vmatpush3.bf16.msra.mxu1 %v1462_v46 }
 0x5ac   : > { %1343 = vmatprep.subr.bf16.mxu1 %v1463_v47 }
 0x5af   : > { %1344 = vmatpush3.bf16.msra.mxu1 %v1464_v48 }
 0x5b0   : > { %1345 = vmatprep.subr.bf16.mxu1 %v1465_v49 }
 0x5b3   : > { %1346 = vmatpush3.bf16.msra.mxu1 %v1466_v50 }
 0x5b4   : > { %1347 = vmatprep.subr.bf16.mxu1 %v1467_v51 }
 0x5b7   : > { %1348 = vmatpush3.bf16.msra.mxu1 %v1468_v52 }
 0x5b8   : > { %1349 = vmatprep.subr.bf16.mxu1 %v1469_v53 }
 0x5bb   : > { %1350 = vmatpush3.bf16.msra.mxu1 %v1470_v54 }
 0x5bc   : > { %1351 = vmatprep.subr.bf16.mxu1 %v1471_v7 }
 0x5bf   : > { %1352 = vmatpush3.bf16.msra.mxu1 %v1472_v9 }
 0x5c0   : > { %1353 = vmatprep.subr.bf16.mxu1 %v1473_v10 }
 0x5c3   : > { %1354 = vmatpush3.bf16.msra.mxu1 %v1474_v11 }
 0x666   : > { %v897_v27 = vpop.f32.mrf.mxu1 }
 0x667   : > { %v898_v28 = vadd.f32 %v1290_v26, %v897_v27 }
 0x668   : > { %v1402_v29 = vpop.f32.mrf.mxu1 }
 0x669   : > { %v1780_v30 = vadd.f32 %v898_v28, %v1689_v0  ;;  %v1455_v0 = vld [vmem:[%s1904_s9 + $0x14] ss:$8 sps:$4 sm:$0xff]   ;;  %v1301_v29 = vld [vmem:[%s1907_s12] ss:$0 sm:$0xff] }
 0x66a   : > { %v900_v31 = vpop.f32.mrf.mxu1  ;;  %992 = vmatprep.subr.bf16.mxu0 %v1455_v0 }
 0x66b   : > { %v906_v32 = vsel %vm494_vm0, %v1780_v30, 0.0  ;;  %993 = vmatpush1.bf16.msra.mxu0 %v1453_v39 }
 0x66c   : > { %907 = vadd.xlane.f32.xlu0 %v906_v32  ;;  %v1403_v33 = vpop.f32.mrf.mxu1  ;;  %994 = vmatprep.subr.bf16.mxu0 %v1458_v40 }
 0x66f   : > { %995 = vmatpush1.bf16.msra.mxu0 %v1456_v42 }
 0x6f5   : > { %v908_v34 = vpop.xlane.xlu0 %907 }
 0x6f6   : > { %v909_v35 = vmul.f32 0.03125, %v908_v34 }
 0x6f8   : > { %v910_v36 = vsub.f32 %v1780_v30, %v909_v35 }
 0x6fa   : > { %v911_v37 = vmul.f32 %v910_v36, %v910_v36  ;;  %v922_v1 = vmul.f32 %v1294_v63, %v910_v36 }
 0x6fc   : > { %v912_v38 = vsel %vm494_vm0, %v911_v37, 0.0 }
 0x6fd   : > { %913 = vadd.xlane.f32.xlu1 %v912_v38 }
 0x786   : > { %v914_v55 = vpop.xlane.xlu1 %913 }
 0x787   : > { %v915_v56 = vmul.f32 0.032258064, %v914_v55 }
 0x789   : > { %1483 = vrsqrt.f32 %v915_v56  ;;  %vm925_vm4 = vcmp.eq.f32.partialorder %v915_v56, inf  ;;  %v928_v59 = vand.u32 2147483648, %v915_v56  ;;  %vm927_vm5 = vcmp.eq.f32.partialorder %v915_v56, 0.0 }
 0x796   : > { %v1484_v57 = vpop.eup %1483 }
 0x797   : > { %v924_v58 = vmul.f32 %v1484_v57, %v915_v56 }
 0x799   : > { %v926_v60 = vsel %vm925_vm4, %v915_v56, %v924_v58 }
 0x79a   : > { %v929_v61 = vsel %vm927_vm5, %v928_v59, %v926_v60 }
 0x79b   : > { %v930_v62 = vadd.f32 1e-06, %v929_v61 }
 0x79d   : > { %1485 = vrcp.f32 %v930_v62 }
 0x7aa   : > { %v1486_v2 = vpop.eup %1485 }
 0x7ab   : > { %v932_v4 = vmul.f32 %v1486_v2, %v922_v1 }
 0x7ad   : > { %v939_v5 = vadd.f32 %v1295_v3, %v932_v4 }
 0x7af   : > { %v940_v6 = vpack.c.bf16 %v939_v5, %v939_v5 }
 0x7b1   : > { %1300 = vmatmul.mubr.msk.bf16.vlgmr.msra.gmra.mxu0 %vm494_vm0, %v940_v6 }
 0x871   : > { %v1014_v19 = vpop.f32.mrf.mxu0 }
 0x872   : > { %v1015_v20 = vadd.f32 %v1014_v19, %v950_v17 }
 0x873   : > { %v1016_v21 = vpop.f32.mrf.mxu0 }
 0x874   : > { %v1017_v22 = vadd.f32 %v1016_v21, %v954_v18  ;;  %v1021_v23 = vmax.f32 %v1015_v20, 0.0 }
 0x875   : > { %v1018_v24 = vpop.f32.mrf.mxu0 }
 0x876   : > { %v1022_v8 = vmax.f32 %v1017_v22, 0.0  ;;  %v1023_v27 = vpack.c.bf16 %v1021_v23, %v1021_v23 }
 0x877   : > { %v1019_v25 = vpop.f32.mrf.mxu0 }
 0x878   : > { %v1024_v26 = vpack.c.bf16 %v1022_v8, %v1022_v8 }
 0x87a   : > { %1192 = vmatprep.mubr.bf16.mxu1 %v1024_v26 }
 0x87b   : > { %1193 = vmatmul.mubr.bf16.vlgmr.msra.gmra.mxu1 %v1023_v27 }
 0x93b   : > { %v1355_v28 = vpop.f32.mrf.mxu1 }
 0x93d   : > { %v1356_v31 = vpop.f32.mrf.mxu1 }
 0x93e   : > { %v1357_v32 = vadd.f32 %v1356_v31, %v1355_v28 }
 0x93f   : > { %v1358_v33 = vpop.f32.mrf.mxu1 }
 0x940   : > { %v1195_v34 = vadd.f32 %v1357_v32, %v1301_v29 }
 0x941   : > { %v1359_v35 = vpop.f32.mrf.mxu1 }
 0x942   : > { %v1200_v36 = vadd.f32 %v1195_v34, %v1780_v30 }
 0x944   : > { %1201 = vst.msk [vmem:[%s485_s27] sm:$0xff] %vm494_vm0, %v1200_v36 }
 0x945   : > { %1500 = shalt.err (!%p1497_p3)
}
 0x946   : > { %s1501_s25 = scalar_lea.hbm %s1214_s30, 128  ;;  %s1505_s27 = scalar_lea.hbm %s1910_s15, 256 }
 0x947   : > { %p1502_p4 = scmp.ne.s32.totalorder %s1214_s30, %s1501_s25  ;;  %p1506_p9 = scmp.lt.s32.totalorder %s1214_s30, %s1910_s15 }
 0x948   : > { %p1507_p10 = scmp.lt.s32.totalorder %s1505_s27, %s1501_s25 }
 0x949   : > { %p1503_p7 = pnand %p1502_p4, %p1674_p5 }
 0x94a   : > { %p1508_p11 = por %p1507_p10, %p1506_p9 }
 0x94b   : > { %p1504_p8 = pneg %p1503_p7 }
 0x94d   : > { %p1509_p12 = pnand %p1508_p11, %p1504_p8 }
 0x94f   : > { %1512 = shalt.err (!%p1509_p12)
}
 0x950   : > { %1404 = dma.vmem_to_hbm [thread:$0]  (%p1674_p5), %s1217_s23, 128, %s1214_s30, %s1203_s17  }
 0x951 PF: > { %p1410_p13 = scmp.ge.s32.totalorder %s1547_s21, 2  ;;  %s1228_s1 = sand.u32 1, %s1535_s18  }
 0x952   : > { %s1229_s0 = scalar_lea.sflag [#allocation3], %s1228_s1 }
 0x953   : > { %p1407_p0 = pnand %p1410_p13, %p1678_p6 }
 0x955   : > { %p1408_p1 = pneg %p1407_p0 }
 0x957   : > { %1530 = dma.done.wait (%p1408_p1), %s1229_s0, 128  }
 0x958   : > { %1532 = vsyncadd (%p1408_p1), %s1229_s0, 4294967168  ;;  %s1924_s2 = sld [smem:[#allocation5_spill]]  ;;  %p25_p2 = scmp.ge.s32.totalorder %s1661_s24, 4  }
 0x959   : > { %s1925_s20 = sld [smem:[#allocation6_spill]]  ;;  %s1926_s18 = smov %s1539_s19 }
 0x95a   : > { %s1928_s21 = smov %s1661_s24  ;;  %27 = sbr.rel (!%p25_p2) target bundleno = 8 (0x8), region = 115 }
 0x95e   : > { %s1927_s19 = smov %s1924_s2 }
 0x95f   :  { %1234 = vsyncpa [#allocation3], 1 }
 0x960   :  { %1236 = vsyncpa [#allocation3 + $0x1], 1 }

</bundles_post_ra>
